<compile_context>
chip_gen: v6e
topology: v6e:2x2x1
jax: 0.10.0
libtpu: 0.0.40
codegen_flags: <defaults>
</compile_context>

<pallas_src>
import jax
import jax.numpy as jnp
from jax.experimental import pallas as pl
from jax.experimental.pallas import tpu as pltpu


def _pick_tile(n, mult, cap):
    """Largest multiple of `mult` dividing n and <= cap, else n (full dim)."""
    best = None
    t = mult
    limit = min(n, cap)
    while t <= limit:
        if n % t == 0:
            best = t
        t += mult
    return best if best is not None else n


def _vmem_limit(est_bytes):
    # >= 32 MiB (past v5e's 16 MiB scoped default), <= 48 MiB (v7x has 64 MiB
    # physical VMEM), with headroom over our own buffer estimate.
    return int(min(48 * 1024 * 1024, max(32 * 1024 * 1024, est_bytes + (8 << 20))))


# ----------------------------------------------------------------------------
# Kernel 1: degree pass — rowsum(A) and colsum(A) in one sweep over row blocks.
# colsum is a resident (1, N) accumulator, so this pass stays "arbitrary".
# ----------------------------------------------------------------------------
def _degree_kernel(a_ref, rowsum_ref, colsum_ref):
    a = a_ref[...]
    rowsum_ref[...] = jnp.sum(a, axis=1, keepdims=True)

    @pl.when(pl.program_id(0) == 0)
    def _():
        colsum_ref[...] = jnp.zeros_like(colsum_ref)

    colsum_ref[...] += jnp.sum(a, axis=0, keepdims=True)


def _adj_degrees(adj_p):
    n = adj_p.shape[0]  # already a multiple of 128
    # ~8 MiB f32 blocks keep the ~0.35us/step grid overhead negligible vs DMA.
    cap_rows = max(8, (8 * 1024 * 1024) // (4 * n))
    tr = _pick_tile(n, 8, cap_rows)
    block_bytes = tr * n * 4
    est = 2 * block_bytes + 2 * tr * 4 + 2 * n * 4
    rowsum, colsum = pl.pallas_call(
        _degree_kernel,
        out_shape=(
            jax.ShapeDtypeStruct((n, 1), jnp.float32),
            jax.ShapeDtypeStruct((1, n), jnp.float32),
        ),
        grid_spec=pltpu.PrefetchScalarGridSpec(
            num_scalar_prefetch=0,
            grid=(n // tr,),
            in_specs=[pl.BlockSpec((tr, n), lambda i: (i, 0))],
            out_specs=[
                pl.BlockSpec((tr, 1), lambda i: (i, 0)),
                pl.BlockSpec((1, n), lambda i: (0, 0)),   # resident accumulator
            ],
        ),
        compiler_params=pltpu.CompilerParams(
            dimension_semantics=("arbitrary",),
            vmem_limit_bytes=_vmem_limit(est)),
    )(adj_p)
    return rowsum, colsum


# ----------------------------------------------------------------------------
# Kernel 2: tiled contraction.  Per row tile i (parallel axis):
#   Z_i = sum_j A_ij @ Y_j   (MXU, accumulated over the j grid axis)
#   partial_i[row] = sum_f Z_i * Y_i      (written once, at the last j)
# Wrapper computes  loss = t1 - sum(partial).
# ----------------------------------------------------------------------------
def _smooth_contract_kernel(a_ref, yj_ref, yi_ref, o_ref, z_acc):
    j = pl.program_id(1)

    @pl.when(j == 0)
    def _():
        z_acc[...] = jnp.zeros_like(z_acc)

    z_acc[...] += jnp.dot(a_ref[...], yj_ref[...],
                          preferred_element_type=jnp.float32)

    @pl.when(j == pl.num_programs(1) - 1)
    def _():
        o_ref[...] = jnp.sum(z_acc[...] * yi_ref[...], axis=1, keepdims=True)


def _contraction_tiles(n_pad, f):
    """Largest (tm, tn) under a VMEM budget; n_pad is a multiple of 128."""
    budget = 22 * 1024 * 1024   # fits v7x's 32 MiB scoped default with headroom
    tm_cap, tn_cap = 512, 1024
    while True:
        tm = _pick_tile(n_pad, 8, tm_cap)
        tn = _pick_tile(n_pad, 128, tn_cap)
        # 2x A blocks + 2x Y_j + 2x Y_i + Z scratch + 2x out (all f32)
        est = 4 * (2 * tm * tn + 2 * tn * f + 3 * tm * f + 2 * tm)
        if est <= budget or (tm_cap <= 8 and tn_cap <= 128):
            return tm, tn, est
        if tn_cap > 128:
            tn_cap //= 2
        else:
            tm_cap = max(8, tm_cap // 2)


def feature_smoothing(adj, X):
    # NOTE: streaming A as bf16 would halve HBM traffic (~2x on this
    # bandwidth-bound kernel) but changes numerics; kept f32 for parity.
    adj = jnp.asarray(adj, jnp.float32)
    X = jnp.asarray(X, jnp.float32)
    n = adj.shape[0]
    f = X.shape[1]

    # Pad to a multiple of 128 so tiles never fall back to the full dimension
    # (odd/prime N).  Zero rows/cols contribute 0 to degrees and to the loss.
    n_pad = ((n + 127) // 128) * 128
    if n_pad != n:
        adj_p = jnp.pad(adj, ((0, n_pad - n), (0, n_pad - n)))
        X_p = jnp.pad(X, ((0, n_pad - n), (0, 0)))
    else:
        adj_p, X_p = adj, X

    # Pass 1 (Pallas): degrees of the symmetrized adjacency, no A.T materialized.
    rowsum, colsum = _adj_degrees(adj_p)
    d = 0.5 * (rowsum[:, 0] + colsum[0, :])          # O(N) glue
    r = jax.lax.rsqrt(d + 0.001)                     # one EUP op, not pow()
    r = jnp.where(jnp.isinf(r), 0.0, r)              # parity with the reference
    Y = r[:, None] * X_p                             # pre-scaled features
    t1 = jnp.sum(d[:, None] * (Y * Y))               # diagonal term, O(N*F)

    tm, tn, est = _contraction_tiles(n_pad, f)

    # TODO(synk): for very large F, keep Y fully resident (constant-index
    # BlockSpec over (N,F)) to avoid re-reading the j-stream once per row tile.
    partial = pl.pallas_call(
        _smooth_contract_kernel,
        out_shape=jax.ShapeDtypeStruct((n_pad, 1), jnp.float32),
        grid_spec=pltpu.PrefetchScalarGridSpec(
            num_scalar_prefetch=0,
            grid=(n_pad // tm, n_pad // tn),
            in_specs=[
                pl.BlockSpec((tm, tn), lambda i, j: (i, j)),   # A block
                pl.BlockSpec((tn, f), lambda i, j: (j, 0)),    # Y_j (contraction)
                pl.BlockSpec((tm, f), lambda i, j: (i, 0)),    # Y_i (epilogue)
            ],
            out_specs=pl.BlockSpec((tm, 1), lambda i, j: (i, 0)),
            scratch_shapes=[pltpu.VMEM((tm, f), jnp.float32)],  # Z_i accumulator
        ),
        # i is independent across row tiles -> "parallel" (v7x 2-core split);
        # j carries the Z accumulator -> "arbitrary".
        compiler_params=pltpu.CompilerParams(
            dimension_semantics=("parallel", "arbitrary"),
            vmem_limit_bytes=_vmem_limit(est)),
    )(adj_p, Y, Y)

    return t1 - jnp.sum(partial)


# ----------------------------------------------------------------------------
# Python-side module mirroring Adj_renew / EstimateAdj.
# ----------------------------------------------------------------------------
class AdjRenew:
    def __init__(self, node_num, nfeat, nfeat_out, adj_lambda):
        self.node_num = node_num
        self.nfeat = nfeat
        self.nfeat_out = nfeat_out
        self.adj_lambda = adj_lambda
        self.estimated_adj = None
        # TODO(synk): fit()/train_adj()'s SGD + PGD proximal optimizers are
        # host-side training logic, not part of the forward pass.

    def fit(self, adj, lr=None):
        # EstimateAdj._init_estimation: parameter copied from the dense adj.
        self.estimated_adj = jnp.asarray(adj, dtype=jnp.float32)

    def forward(self):
        # PyTorch forward() returns the parameter itself: zero-cost return.
        return self.estimated_adj

    def feature_smoothing(self, adj, X):
        return feature_smoothing(adj, X)

    # TODO(synk): the_norm() depends on estimator._normalize, which is not
    # defined in the provided spec.


# ----------------------------------------------------------------------------
# Pure-JAX reference for verification (direct transcription of torch code).
# ----------------------------------------------------------------------------
def _smoothing_ref(adj, X):
    a = (adj.T + adj) / 2.0
    rowsum = a.sum(1)
    L = jnp.diag(rowsum) - a
    r_inv = jnp.power(rowsum + 0.001, -0.5)
    r_inv = jnp.where(jnp.isinf(r_inv), 0.0, r_inv)
    Ln = jnp.diag(r_inv) @ L @ jnp.diag(r_inv)
    return jnp.trace(X.T @ Ln @ X)


if __name__ == "__main__":
    # --- small test (exercises the padding path: 16 -> 128) ---
    node_num, nfeat = 16, 8
    key = jax.random.PRNGKey(0)
    k_adj, k_x = jax.random.split(key)
    raw = jax.random.uniform(k_adj, (node_num, node_num), dtype=jnp.float32)
    adj = ((raw + raw.T) / 2.0 > 0.5).astype(jnp.float32)       # symmetric 0/1
    X = jax.random.normal(k_x, (node_num, nfeat), dtype=jnp.float32)

    model = AdjRenew(node_num=node_num, nfeat=nfeat, nfeat_out=nfeat, adj_lambda=1.0)
    model.fit(adj)

    out_adj = jax.block_until_ready(model.forward())
    assert out_adj.shape == (node_num, node_num)
    assert jnp.allclose(out_adj, adj), "forward() mismatch"

    loss = jax.block_until_ready(model.feature_smoothing(out_adj, X))
    loss_ref = _smoothing_ref(adj, X)
    assert jnp.allclose(loss, loss_ref, rtol=1e-4, atol=1e-4), (loss, loss_ref)

    # --- larger test exercising multi-block i (parallel) and j (accumulation)
    #     paths plus the multi-block degree sweep (no padding: 1536 % 128 == 0).
    n2, f2 = 1536, 32
    k1, k2 = jax.random.split(jax.random.PRNGKey(1))
    raw2 = jax.random.uniform(k1, (n2, n2), dtype=jnp.float32)
    adj2 = ((raw2 + raw2.T) / 2.0 > 0.5).astype(jnp.float32)
    X2 = jax.random.normal(k2, (n2, f2), dtype=jnp.float32)
    loss2 = jax.block_until_ready(feature_smoothing(adj2, X2))
    loss2_ref = _smoothing_ref(adj2, X2)
    assert jnp.allclose(loss2, loss2_ref, rtol=2e-3, atol=1e-1), (loss2, loss2_ref)

    print("KERNEL_OK")
</pallas_src>

<mosaic_0001>
module attributes {stable_mosaic.version = 11 : i64} {
  func.func @_degree_kernel(%arg0: i32, %arg1: memref<128x128xf32, #tpu.memory_space<vmem>>, %arg2: memref<128x1xf32, #tpu.memory_space<vmem>>, %arg3: memref<1x128xf32, #tpu.memory_space<vmem>>) attributes {dimension_semantics = [#tpu.dimension_semantics<arbitrary>], iteration_bounds = array<i64: 1>, scalar_prefetch = 0 : i64, scratch_operands = 0 : i64, tpu.core_type = #tpu.core_type<tc>, window_params = [{transform_indices = @transform_0, window_bounds = array<i64: 128, 128>}, {transform_indices = @transform_1, window_bounds = array<i64: 128, 1>}, {pipeline_mode = #tpu.pipeline_mode<synchronous>, transform_indices = @transform_2, window_bounds = array<i64: 1, 128>}]} {
    %c0 = arith.constant 0 : index
    %c0_0 = arith.constant 0 : index
    %0 = vector.load %arg1[%c0, %c0_0] : memref<128x128xf32, #tpu.memory_space<vmem>>, vector<128x128xf32>
    %cst = arith.constant dense<0.000000e+00> : vector<128xf32>
    %1 = vector.multi_reduction <add>, %0, %cst [1] : vector<128x128xf32> to vector<128xf32>
    %2 = vector.shape_cast %1 : vector<128xf32> to vector<128x1xf32>
    %c0_1 = arith.constant 0 : index
    %c0_2 = arith.constant 0 : index
    %3 = vector.load %arg2[%c0_1, %c0_2] : memref<128x1xf32, #tpu.memory_space<vmem>>, vector<128x1xf32>
    tpu.vector_store %arg2[%c0_1, %c0_2], %2 {strides = array<i32>} : memref<128x1xf32, #tpu.memory_space<vmem>>, vector<128x1xf32>,
    %c0_i32 = arith.constant 0 : i32
    %4 = arith.cmpi eq, %arg0, %c0_i32 : i32
    %5 = arith.extui %4 : i1 to i32
    %c0_i32_3 = arith.constant 0 : i32
    %6 = arith.cmpi ne, %5, %c0_i32_3 : i32
    scf.if %6 {
      %cst_9 = arith.constant 0.000000e+00 : f32
      %12 = vector.broadcast %cst_9 : f32 to vector<1x128xf32>
      %c0_10 = arith.constant 0 : index
      %c0_11 = arith.constant 0 : index
      %13 = vector.load %arg3[%c0_10, %c0_11] : memref<1x128xf32, #tpu.memory_space<vmem>>, vector<1x128xf32>
      tpu.vector_store %arg3[%c0_10, %c0_11], %12 {strides = array<i32>} : memref<1x128xf32, #tpu.memory_space<vmem>>, vector<1x128xf32>,
    } else {
    }
    %c0_4 = arith.constant 0 : index
    %c0_5 = arith.constant 0 : index
    %7 = vector.load %arg3[%c0_4, %c0_5] : memref<1x128xf32, #tpu.memory_space<vmem>>, vector<1x128xf32>
    %cst_6 = arith.constant dense<0.000000e+00> : vector<128xf32>
    %8 = vector.multi_reduction <add>, %0, %cst_6 [0] : vector<128x128xf32> to vector<128xf32>
    %9 = vector.shape_cast %8 : vector<128xf32> to vector<1x128xf32>
    %10 = arith.addf %7, %9 : vector<1x128xf32>
    %c0_7 = arith.constant 0 : index
    %c0_8 = arith.constant 0 : index
    %11 = vector.load %arg3[%c0_7, %c0_8] : memref<1x128xf32, #tpu.memory_space<vmem>>, vector<1x128xf32>
    tpu.vector_store %arg3[%c0_7, %c0_8], %10 {strides = array<i32>} : memref<1x128xf32, #tpu.memory_space<vmem>>, vector<1x128xf32>,
    return
  }
  func.func @transform_0(%arg0: i32) -> (i32, i32) {
    %c0_i32 = arith.constant 0 : i32
    %c0_i32_0 = arith.constant 0 : i32
    return %arg0, %c0_i32 : i32, i32
  }
  func.func @transform_1(%arg0: i32) -> (i32, i32) {
    %c0_i32 = arith.constant 0 : i32
    %c0_i32_0 = arith.constant 0 : i32
    return %arg0, %c0_i32 : i32, i32
  }
  func.func @transform_2(%arg0: i32) -> (i32, i32) {
    %c0_i32 = arith.constant 0 : i32
    %c0_i32_0 = arith.constant 0 : i32
    %c0_i32_1 = arith.constant 0 : i32
    return %c0_i32, %c0_i32_0 : i32, i32
  }
}

</mosaic_0001>

<bundles_post_ra>
// kernel: tpu_custom_call.1
= control target key start
LH: loop header
LB: loop body
LE: loop exit
PB: predicated region body
PF: predicated region fallthrough
CT: control target
= control target key end

     0   :  { %8 = vsyncpa [#allocation3], 0  ;;  %s277_s0 = inlined_call_operand.hbm [shape: f32[128,128], index: 0, kind: input, shape index: {}]   ;;  %s278_s1 = inlined_call_operand.vmem [shape: f32[128,1], index: 1, kind: output, shape index: {0}]   ;;  %s279_s2 = inlined_call_operand.hbm [shape: f32[1,128], index: 2, kind: output, shape index: {1}]  }
   0x1   :  { %9 = vsyncpa [#allocation4], 0  ;;  %s187_s9 = smov [#allocation2]  }
   0x2   :  { %s15_s10 = sshll.u32 %s187_s9, 4  ;;  %s16_s10 = int_to_ptr.vmem [resolvable:$true] %s15_s10 }
   0x3   :  { %s151_s11 = scalar_lea.vmem %s16_s10, 2048  ;;  %p156_p1 = scmp.lt.s32.totalorder %s16_s10, %s16_s10 }
   0x4   :  { %p152_p0 = scmp.ne.s32.totalorder %s16_s10, %s151_s11  ;;  %p157_p2 = scmp.lt.s32.totalorder %s151_s11, %s151_s11 }
   0x6   :  { %p158_p3 = por %p157_p2, %p156_p1 }
   0x8   :  { %p159_p4 = pnand %p158_p3, %p152_p0 }
   0xa   :  { %162 = shalt.err (!%p159_p4)
}
   0xb   :  { %s188_s12 = smov 128   ;;  %s189_s13 = smov 8  }
   0xc   :  { %21 = dma.hbm_to_vmem [thread:$0]  %s277_s0, 2048, %s16_s10, [#allocation3], %s188_s12, %s188_s12, %s189_s13  }
   0xd   :  { %183 = dma.done.wait [#allocation3], 2048  }
   0xe   :  { %184 = vsyncadd [#allocation3], 4294965248  ;;  %v27_v0 = vld [vmem:[#allocation2 + $0x10] sm:$0xff]  ;;  %v25_v1 = vld [vmem:[#allocation2] sm:$0xff]  ;;  %v190_v30 = vmov 0.0   ;;  %s191_s0 = smov [#allocation5]  }
   0xf   :  { %45 = vadd.xlane.f32.xlu1 %v27_v0  ;;  %41 = vadd.xlane.f32.xlu0 %v25_v1  ;;  %v26_v2 = vld [vmem:[#allocation2 + $0x8] sm:$0xff]  ;;  %v28_v3 = vld [vmem:[#allocation2 + $0x18] sm:$0xff]  ;;  %v29_v7 = vld [vmem:[#allocation2 + $0x20] sm:$0xff]  ;;  %94 = vst [vmem:[#allocation5] sm:$0x1] %v190_v30  ;;  %s127_s16 = sshll.u32 %s191_s0, 4  ;;  %s128_s16 = int_to_ptr.vmem [resolvable:$true] %s127_s16 }
  0x10   :  { %v96_v4 = vadd.f32 %v26_v2, %v25_v1  ;;  %v30_v6 = vld [vmem:[#allocation2 + $0x28] sm:$0xff]  ;;  %v32_v10 = vld [vmem:[#allocation2 + $0x38] sm:$0xff]  ;;  %v31_v11 = vld [vmem:[#allocation2 + $0x30] sm:$0xff]  ;;  %s163_s17 = scalar_lea.vmem %s128_s16, 16  ;;  %s167_s18 = scalar_lea.vmem %s128_s16, 32 }
  0x11   :  { %v34_v14 = vld [vmem:[#allocation2 + $0x48] sm:$0xff]  ;;  %v33_v15 = vld [vmem:[#allocation2 + $0x40] sm:$0xff]  ;;  %v36_v18 = vld [vmem:[#allocation2 + $0x58] sm:$0xff]  ;;  %p164_p5 = scmp.ne.s32.totalorder %s128_s16, %s163_s17  ;;  %p168_p6 = scmp.lt.s32.totalorder %s128_s16, %s128_s16 }
  0x12   :  { %v97_v5 = vadd.f32 %v96_v4, %v27_v0  ;;  %v35_v19 = vld [vmem:[#allocation2 + $0x50] sm:$0xff]  ;;  %v38_v22 = vld [vmem:[#allocation2 + $0x68] sm:$0xff]  ;;  %v37_v23 = vld [vmem:[#allocation2 + $0x60] sm:$0xff]  ;;  %p169_p7 = scmp.lt.s32.totalorder %s167_s18, %s163_s17 }
  0x13   :  { %47 = vadd.xlane.f32.xlu1 %v28_v3  ;;  %43 = vadd.xlane.f32.xlu0 %v26_v2  ;;  %v40_v26 = vld [vmem:[#allocation2 + $0x78] sm:$0xff]  ;;  %v39_v27 = vld [vmem:[#allocation2 + $0x70] sm:$0xff] }
  0x14   :  { %v98_v8 = vadd.f32 %v97_v5, %v28_v3  ;;  %p170_p8 = por %p169_p7, %p168_p6 }
  0x16   :  { %v99_v9 = vadd.f32 %v98_v8, %v29_v7  ;;  %v95_v37 = vld [vmem:[#allocation5] sm:$0x1]  ;;  %p171_p9 = pnand %p170_p8, %p164_p5 }
  0x17   :  { %51 = vadd.xlane.f32.xlu1 %v30_v6  ;;  %49 = vadd.xlane.f32.xlu0 %v29_v7 }
  0x18   :  { %v100_v12 = vadd.f32 %v99_v9, %v30_v6 }
  0x1a   :  { %v101_v13 = vadd.f32 %v100_v12, %v31_v11 }
  0x1b   :  { %55 = vadd.xlane.f32.xlu1 %v32_v10  ;;  %53 = vadd.xlane.f32.xlu0 %v31_v11 }
  0x1c   :  { %v102_v16 = vadd.f32 %v101_v13, %v32_v10 }
  0x1e   :  { %v103_v17 = vadd.f32 %v102_v16, %v33_v15 }
  0x1f   :  { %59 = vadd.xlane.f32.xlu1 %v34_v14  ;;  %57 = vadd.xlane.f32.xlu0 %v33_v15 }
  0x20   :  { %v104_v20 = vadd.f32 %v103_v17, %v34_v14 }
  0x22   :  { %v105_v21 = vadd.f32 %v104_v20, %v35_v19 }
  0x23   :  { %63 = vadd.xlane.f32.xlu1 %v36_v18  ;;  %61 = vadd.xlane.f32.xlu0 %v35_v19 }
  0x24   :  { %v106_v24 = vadd.f32 %v105_v21, %v36_v18 }
  0x26   :  { %v107_v25 = vadd.f32 %v106_v24, %v37_v23 }
  0x27   :  { %67 = vadd.xlane.f32.xlu1 %v38_v22  ;;  %65 = vadd.xlane.f32.xlu0 %v37_v23 }
  0x28   :  { %v108_v28 = vadd.f32 %v107_v25, %v38_v22 }
  0x2a   :  { %v109_v29 = vadd.f32 %v108_v28, %v39_v27 }
  0x2b   :  { %71 = vadd.xlane.f32.xlu1 %v40_v26  ;;  %69 = vadd.xlane.f32.xlu0 %v39_v27 }
  0x2c   :  { %v110_v31 = vadd.f32 %v109_v29, %v40_v26 }
  0x2e   :  { %v111_v32 = vrot.slane %v110_v31, 4 }
  0x30   :  { %v112_v33 = vadd.f32 %v111_v32, %v110_v31 }
  0x32   :  { %v113_v34 = vrot.slane %v112_v33, 2 }
  0x34   :  { %v114_v35 = vadd.f32 %v113_v34, %v112_v33 }
  0x36   :  { %v115_v36 = vrot.slane %v114_v35, 1 }
  0x38   :  { %v116_v38 = vadd.f32 %v115_v36, %v114_v35 }
  0x3a   :  { %v117_v39 = vadd.f32 %v116_v38, %v95_v37 }
  0x3c   :  { %118 = vst [vmem:[#allocation5] sm:$0x1] %v117_v39 }
  0x3d   :  { %174 = shalt.err (!%p171_p9)
}
  0x3e   :  { %130 = dma.vmem_to_hbm [thread:$0]  %s128_s16, 16, %s279_s2, [#allocation4]   ;;  %vm73_vm0 = vcmask 7168  }
  0x98   :  { %v46_v40 = vpop.xlane.xlu1 %45  ;;  %v42_v41 = vpop.xlane.xlu0 %41 }
  0x99   :  { %76 = vst.msk [vmem:[%s278_s1 + $0x10] sm:$0xff] %vm73_vm0, %v46_v40  ;;  %74 = vst.msk [vmem:[%s278_s1] sm:$0xff] %vm73_vm0, %v42_v41 }
  0x9c   :  { %v48_v42 = vpop.xlane.xlu1 %47  ;;  %v44_v43 = vpop.xlane.xlu0 %43 }
  0x9d   :  { %77 = vst.msk [vmem:[%s278_s1 + $0x18] sm:$0xff] %vm73_vm0, %v48_v42  ;;  %75 = vst.msk [vmem:[%s278_s1 + $0x8] sm:$0xff] %vm73_vm0, %v44_v43 }
  0xa0   :  { %v52_v44 = vpop.xlane.xlu1 %51  ;;  %v50_v45 = vpop.xlane.xlu0 %49 }
  0xa1   :  { %79 = vst.msk [vmem:[%s278_s1 + $0x28] sm:$0xff] %vm73_vm0, %v52_v44  ;;  %78 = vst.msk [vmem:[%s278_s1 + $0x20] sm:$0xff] %vm73_vm0, %v50_v45 }
  0xa4   :  { %v56_v46 = vpop.xlane.xlu1 %55  ;;  %v54_v47 = vpop.xlane.xlu0 %53 }
  0xa5   :  { %81 = vst.msk [vmem:[%s278_s1 + $0x38] sm:$0xff] %vm73_vm0, %v56_v46  ;;  %80 = vst.msk [vmem:[%s278_s1 + $0x30] sm:$0xff] %vm73_vm0, %v54_v47 }
  0xa8   :  { %v60_v48 = vpop.xlane.xlu1 %59  ;;  %v58_v49 = vpop.xlane.xlu0 %57 }
  0xa9   :  { %83 = vst.msk [vmem:[%s278_s1 + $0x48] sm:$0xff] %vm73_vm0, %v60_v48  ;;  %82 = vst.msk [vmem:[%s278_s1 + $0x40] sm:$0xff] %vm73_vm0, %v58_v49 }
  0xac   :  { %v64_v50 = vpop.xlane.xlu1 %63  ;;  %v62_v51 = vpop.xlane.xlu0 %61 }
  0xad   :  { %85 = vst.msk [vmem:[%s278_s1 + $0x58] sm:$0xff] %vm73_vm0, %v64_v50  ;;  %84 = vst.msk [vmem:[%s278_s1 + $0x50] sm:$0xff] %vm73_vm0, %v62_v51 }
  0xb0   :  { %v68_v52 = vpop.xlane.xlu1 %67  ;;  %v66_v53 = vpop.xlane.xlu0 %65 }
  0xb1   :  { %87 = vst.msk [vmem:[%s278_s1 + $0x68] sm:$0xff] %vm73_vm0, %v68_v52  ;;  %86 = vst.msk [vmem:[%s278_s1 + $0x60] sm:$0xff] %vm73_vm0, %v66_v53 }
  0xb4   :  { %v72_v54 = vpop.xlane.xlu1 %71  ;;  %v70_v55 = vpop.xlane.xlu0 %69 }
  0xb5   :  { %89 = vst.msk [vmem:[%s278_s1 + $0x78] sm:$0xff] %vm73_vm0, %v72_v54  ;;  %88 = vst.msk [vmem:[%s278_s1 + $0x70] sm:$0xff] %vm73_vm0, %v70_v55 }
  0xb6   :  { %185 = dma.done.wait [#allocation4], 16  }
  0xb7   :  { %186 = vsyncadd [#allocation4], 4294967280 }
  0xb8   :  { %136 = vsyncpa [#allocation3], 1 }
  0xb9   :  { %137 = vsyncpa [#allocation4], 1 }

</bundles_post_ra>
